<compile_context>
chip_gen: v5e
topology: v5e:2x2
jax: 0.10.0
libtpu: 0.0.40
codegen_flags: <defaults>
</compile_context>

<pallas_src>
import functools

import jax
import jax.numpy as jnp
from jax.experimental import pallas as pl
from jax.experimental.pallas import tpu as pltpu

_LANE = 128


def _round_up(v, m):
    return -(-v // m) * m


def _device_kind():
    try:
        return jax.devices()[0].device_kind.lower()
    except Exception:
        return ""


def _vmem_capacity_bytes():
    try:
        return int(pltpu.get_tpu_info().vmem_capacity_bytes)
    except Exception:
        return 64 << 20          # conservative (v7x-sized) fallback


def _sse3d_kernel(x_ref, a_ref, r_ref, b_ref, o_ref, *, gate_precision,
                  rep_precision):
    # x_ref : (TM, C)   lane-dense packed activations
    # a_ref : (C, G)    segmented weight matrix (resident in VMEM)
    # r_ref : (G, C)    0/1 segment-replication matrix (resident in VMEM)
    # b_ref : (1,)      conv bias scalar (SMEM)
    # o_ref : (TM, C)
    x = x_ref[...]
    # Segmented row reduce on the MXU: s[r, g] = sum_{lane in segment g} x * w.
    s = jnp.dot(x, a_ref[...], preferred_element_type=jnp.float32,
                precision=gate_precision)
    gate = jax.nn.sigmoid(s + b_ref[0])                 # (TM, G) f32, ~M sigmoids
    # Broadcast the per-location gate back over its W lanes (MXU; exact, R is 0/1).
    gate_full = jnp.dot(gate.astype(r_ref.dtype), r_ref[...],
                        preferred_element_type=x.dtype,
                        precision=rep_precision)        # (TM, C) in x.dtype
    o_ref[...] = (x * gate_full.astype(x.dtype)).astype(o_ref.dtype)


def spatial_se_layer_3d(x_ncdhw, conv_weight, conv_bias, *, tm=None,
                        target_tile_bytes=4 << 20):
    """x_ncdhw: (N, 1, D, H, W); conv_weight: (1,1,1,1,W); conv_bias: (1,)."""
    N, Cin, D, H, W = x_ncdhw.shape
    assert Cin == 1, "SpatialSELayer3D expects a single input channel"
    assert conv_weight.shape[-1] == W, "kernel width must equal num_channels (== W)"

    dtype = x_ncdhw.dtype
    itemsize = jnp.dtype(dtype).itemsize
    M = N * D * H

    # Lane-dense packing: fold `pack` spatial rows of width W into C lanes.
    if W <= 256 and 256 % W == 0:
        pack = min(256 // W, _LANE)
    else:
        pack = 1
    C = pack * W
    G = _LANE                     # gate columns padded to one full lane group

    x2 = x_ncdhw.reshape(M, W)
    tail = M % pack
    if tail:
        # Tiny tail pad (< pack rows); only copy anywhere in this pipeline.
        x2 = jnp.pad(x2, ((0, pack - tail), (0, 0)))
    rows = (M + pack - 1) // pack
    xp = x2.reshape(rows, C)      # contiguous reshape: free

    kind = _device_kind()
    num_tc = 2 if "v7" in kind else 1
    is_v5e = ("v5 lite" in kind) or ("v5lite" in kind) or ("v5e" in kind)

    if dtype == jnp.bfloat16:
        mm_dtype = jnp.bfloat16
        gate_precision = jax.lax.Precision.DEFAULT
        rep_precision = jax.lax.Precision.DEFAULT
    else:
        mm_dtype = jnp.float32
        # v5e: HIGH (3 bf16 passes) keeps the MXU well under the HBM roofline;
        # v6e/v7x: HIGHEST is free.
        gate_precision = (jax.lax.Precision.HIGH if is_v5e
                          else jax.lax.Precision.HIGHEST)
        rep_precision = gate_precision

    w = conv_weight.reshape(W).astype(jnp.float32)
    b = conv_bias.reshape(1).astype(jnp.float32)

    seg = jnp.arange(C) // W                              # (C,) segment per lane
    gid = jnp.arange(G)                                   # (G,)
    sel = seg[:, None] == gid[None, :]                    # (C, G) one-hot segments
    a1 = jnp.where(sel, jnp.tile(w, pack)[:, None], 0.0).astype(mm_dtype)  # (C, G)
    rmat = sel.T.astype(mm_dtype)                         # (G, C) 0/1 replication

    # Row-tile size: multi-MiB blocks amortize the ~0.35us/step pipeline
    # overhead; clamped so double-buffered in+out stays well under the chip's
    # physical VMEM (queried, not assumed).
    bytes_per_row = C * itemsize
    vmem_cap = _vmem_capacity_bytes()
    if tm is None:
        tm = max(8, (target_tile_bytes // bytes_per_row) // 8 * 8)
        tm_cap = max(8, ((vmem_cap // 8) // bytes_per_row) // 8 * 8)
        tm = min(tm, tm_cap)
        if rows < 8:
            tm = rows                                     # full-extent block
        else:
            tm = min(tm, (rows // 8) * 8)                 # last block ragged, not oversize
            if num_tc >= 2 and rows > 8:
                # Only split small problems on multi-TC chips, with an even grid
                # so both TensorCores get equal shares.
                g = pl.cdiv(rows, tm)
                g_even = _round_up(max(g, 2), 2)
                tm = min(tm, max(8, _round_up(pl.cdiv(rows, g_even), 8)))
                tm = min(tm, (rows // 8) * 8)
    grid = pl.cdiv(rows, tm)

    tile_bytes = tm * bytes_per_row
    weight_bytes = 2 * C * G * jnp.dtype(mm_dtype).itemsize
    need = 4 * tile_bytes + 2 * weight_bytes + (2 << 20)
    vmem_limit = int(min(vmem_cap * 3 // 4, max(32 << 20, need)))

    kernel = functools.partial(_sse3d_kernel, gate_precision=gate_precision,
                               rep_precision=rep_precision)

    out = pl.pallas_call(
        kernel,
        out_shape=jax.ShapeDtypeStruct((rows, C), dtype),
        grid_spec=pltpu.PrefetchScalarGridSpec(
            num_scalar_prefetch=0,
            grid=(grid,),
            in_specs=[
                pl.BlockSpec((tm, C), lambda i: (i, 0)),             # activations
                pl.BlockSpec((C, G), lambda i: (0, 0)),              # segment weights
                pl.BlockSpec((G, C), lambda i: (0, 0)),              # replication
                pl.BlockSpec(memory_space=pltpu.MemorySpace.SMEM),   # bias scalar
            ],
            out_specs=pl.BlockSpec((tm, C), lambda i: (i, 0)),
        ),
        compiler_params=pltpu.CompilerParams(
            dimension_semantics=("parallel",),
            vmem_limit_bytes=vmem_limit,
        ),
        cost_estimate=pl.CostEstimate(
            flops=int(2 * rows * C * G + 2 * rows * G * C + rows * C),
            transcendentals=int(rows * pack),
            bytes_accessed=int(2 * rows * C * itemsize),
        ),
    )(xp, a1, rmat, b)

    out2 = out.reshape(rows * pack, W)
    if tail:
        out2 = out2[:M]                                   # only when tail-padded
    return out2.reshape(N, Cin, D, H, W)


def _reference(x_ncdhw, conv_weight, conv_bias):
    # Pure-JAX reference of the PyTorch forward (exact f32 path).
    w = conv_weight.reshape(-1).astype(jnp.float32)
    s = jnp.sum(x_ncdhw.astype(jnp.float32) * w, axis=-1, keepdims=True)
    s = s + conv_bias.astype(jnp.float32)
    return (x_ncdhw.astype(jnp.float32) * jax.nn.sigmoid(s)).astype(x_ncdhw.dtype)


if __name__ == "__main__":
    # Small, module-consistent shapes: num_channels = 32 (conv kernel width),
    # input (N=2, C_in=1, D=4, H=8, W=32).
    num_channels = 32
    N, D, H = 2, 4, 8

    key = jax.random.PRNGKey(0)
    kx, kw, kb = jax.random.split(key, 3)

    x = jax.random.normal(kx, (N, 1, D, H, num_channels), dtype=jnp.float32)
    conv_weight = jax.random.normal(kw, (1, 1, 1, 1, num_channels), dtype=jnp.float32) * 0.1
    conv_bias = jax.random.normal(kb, (1,), dtype=jnp.float32) * 0.1

    out = spatial_se_layer_3d(x, conv_weight, conv_bias)
    out = jax.block_until_ready(out)

    ref = _reference(x, conv_weight, conv_bias)
    assert out.shape == x.shape
    assert jnp.allclose(out, ref, atol=2e-5, rtol=2e-5), "mismatch vs reference"

    print("KERNEL_OK")
</pallas_src>

<mosaic_0001>
module attributes {stable_mosaic.version = 11 : i64} {
  func.func @_sse3d_kernel(%arg0: i32, %arg1: memref<8x256xf32, #tpu.memory_space<vmem>>, %arg2: memref<256x128xf32, #tpu.memory_space<vmem>>, %arg3: memref<128x256xf32, #tpu.memory_space<vmem>>, %arg4: memref<1xf32, #tpu.memory_space<smem>>, %arg5: memref<8x256xf32, #tpu.memory_space<vmem>>) attributes {dimension_semantics = [#tpu.dimension_semantics<parallel>], iteration_bounds = array<i64: 1>, scalar_prefetch = 0 : i64, scratch_operands = 0 : i64, tpu.core_type = #tpu.core_type<tc>, window_params = [{transform_indices = @transform_0, window_bounds = array<i64: 8, 256>}, {pipeline_mode = #tpu.pipeline_mode<synchronous>, transform_indices = @transform_1, window_bounds = array<i64: 256, 128>}, {pipeline_mode = #tpu.pipeline_mode<synchronous>, transform_indices = @transform_2, window_bounds = array<i64: 128, 256>}, {transform_indices = @transform_3, window_bounds = array<i64: 1>}, {transform_indices = @transform_4, window_bounds = array<i64: 8, 256>}]} {
    %c0 = arith.constant 0 : index
    %c0_0 = arith.constant 0 : index
    %0 = vector.load %arg1[%c0, %c0_0] : memref<8x256xf32, #tpu.memory_space<vmem>>, vector<8x256xf32>
    %c0_1 = arith.constant 0 : index
    %c0_2 = arith.constant 0 : index
    %1 = vector.load %arg2[%c0_1, %c0_2] : memref<256x128xf32, #tpu.memory_space<vmem>>, vector<256x128xf32>
    %cst = arith.constant dense<0.000000e+00> : vector<8x128xf32>
    %2 = tpu.matmul %0, %1, %cst {dimension_numbers = #tpu.dot_dimension_numbers<[1], [0], [0], [1], [0, 0, 1, 1], [], []>, precision = #tpu.contract_precision<fp32>} : vector<8x256xf32>, vector<256x128xf32>, vector<8x128xf32> -> vector<8x128xf32>
    %c0_3 = arith.constant 0 : index
    %3 = memref.load %arg4[%c0_3] : memref<1xf32, #tpu.memory_space<smem>>
    %4 = vector.broadcast %3 : f32 to vector<8x128xf32>
    %5 = arith.addf %2, %4 : vector<8x128xf32>
    %6 = arith.negf %5 : vector<8x128xf32>
    %7 = math.exp %6 : vector<8x128xf32>
    %cst_4 = arith.constant 1.000000e+00 : f32
    %8 = vector.broadcast %cst_4 : f32 to vector<8x128xf32>
    %9 = arith.addf %8, %7 : vector<8x128xf32>
    %10 = arith.divf %8, %9 : vector<8x128xf32>
    %c0_5 = arith.constant 0 : index
    %c0_6 = arith.constant 0 : index
    %11 = vector.load %arg3[%c0_5, %c0_6] : memref<128x256xf32, #tpu.memory_space<vmem>>, vector<128x256xf32>
    %cst_7 = arith.constant dense<0.000000e+00> : vector<8x256xf32>
    %12 = tpu.matmul %10, %11, %cst_7 {dimension_numbers = #tpu.dot_dimension_numbers<[1], [0], [0], [1], [0, 0, 1, 1], [], []>, precision = #tpu.contract_precision<fp32>} : vector<8x128xf32>, vector<128x256xf32>, vector<8x256xf32> -> vector<8x256xf32>
    %13 = arith.mulf %0, %12 : vector<8x256xf32>
    %c0_8 = arith.constant 0 : index
    %c0_9 = arith.constant 0 : index
    %14 = vector.load %arg5[%c0_8, %c0_9] : memref<8x256xf32, #tpu.memory_space<vmem>>, vector<8x256xf32>
    tpu.vector_store %arg5[%c0_8, %c0_9], %13 {strides = array<i32>} : memref<8x256xf32, #tpu.memory_space<vmem>>, vector<8x256xf32>,
    return
  }
  func.func @transform_0(%arg0: i32) -> (i32, i32) {
    %c0_i32 = arith.constant 0 : i32
    %c0_i32_0 = arith.constant 0 : i32
    return %arg0, %c0_i32 : i32, i32
  }
  func.func @transform_1(%arg0: i32) -> (i32, i32) {
    %c0_i32 = arith.constant 0 : i32
    %c0_i32_0 = arith.constant 0 : i32
    %c0_i32_1 = arith.constant 0 : i32
    return %c0_i32, %c0_i32_0 : i32, i32
  }
  func.func @transform_2(%arg0: i32) -> (i32, i32) {
    %c0_i32 = arith.constant 0 : i32
    %c0_i32_0 = arith.constant 0 : i32
    %c0_i32_1 = arith.constant 0 : i32
    return %c0_i32, %c0_i32_0 : i32, i32
  }
  func.func @transform_3(%arg0: i32) -> i32 {
    %c0_i32 = arith.constant 0 : i32
    %c0_i32_0 = arith.constant 0 : i32
    return %c0_i32 : i32
  }
  func.func @transform_4(%arg0: i32) -> (i32, i32) {
    %c0_i32 = arith.constant 0 : i32
    %c0_i32_0 = arith.constant 0 : i32
    return %arg0, %c0_i32 : i32, i32
  }
}

</mosaic_0001>

<bundles_post_ra>
// kernel: tpu_custom_call.1
= control target key start
LH: loop header
LB: loop body
LE: loop exit
PB: predicated region body
PF: predicated region fallthrough
CT: control target
= control target key end

     0   :  { %10 = vsyncpa [#allocation4], 0  ;;  %s2708_s0 = inlined_call_operand.hbm [shape: f32[8,256], index: 0, kind: input, shape index: {}]   ;;  %s2709_s1 = inlined_call_operand.hbm [shape: f32[256,128], index: 1, kind: input, shape index: {}]   ;;  %s2710_s2 = inlined_call_operand.hbm [shape: f32[128,256], index: 2, kind: input, shape index: {}]   ;;  %s2711_s3 = inlined_call_operand.<no memory space> [shape: f32[1], index: 3, kind: input, shape index: {}]   ;;  %s2712_s4 = inlined_call_operand.hbm [shape: f32[8,256], index: 4, kind: output, shape index: {}]  }
   0x1   :  { %11 = vsyncpa [#allocation7], 0  ;;  %s28_s17 = sshll.u32 %s2709_s1, 4  ;;  %s29_s17 = int_to_ptr.hbm [resolvable:$true] %s28_s17 }
   0x2   :  { %12 = vsyncpa [#allocation5], 0  ;;  %s1654_s18 = smov [#allocation6]   ;;  %s18_s22 = sshll.u32 %s2708_s0, 4  ;;  %s19_s22 = int_to_ptr.hbm [resolvable:$true] %s18_s22 }
   0x3   :  { %s30_s19 = sshll.u32 %s1654_s18, 4  ;;  %s1655_s23 = smov 128   ;;  %s31_s19 = int_to_ptr.vmem [resolvable:$true] %s30_s19 }
   0x4   :  { %s1656_s24 = smov 8   ;;  %s1657_s25 = smov [#allocation3]  }
   0x5   :  { %36 = dma.hbm_to_vmem [thread:$0]  %s29_s17, 4096, %s31_s19, [#allocation7], %s1655_s23, %s1655_s23, %s1656_s24  }
   0x6   :  { %s20_s26 = sshll.u32 %s1657_s25, 4  ;;  %s41_s29 = sshll.u32 %s2710_s2, 4  ;;  %s21_s26 = int_to_ptr.vmem [resolvable:$true] %s20_s26  ;;  %s42_s29 = int_to_ptr.hbm [resolvable:$true] %s41_s29 }
   0x7   :  { %23 = dma.hbm_to_vmem [thread:$0]  %s19_s22, 256, %s21_s26, [#allocation4]  }
   0x8   :  { %s1658_s1 = smov [#allocation8]   ;;  %s1659_s5 = smov 256  }
   0x9   :  { %s43_s30 = sshll.u32 %s1658_s1, 4  ;;  %s1660_s6 = smov 16   ;;  %s44_s30 = int_to_ptr.vmem [resolvable:$true] %s43_s30 }
   0xa   :  { %49 = dma.hbm_to_vmem [thread:$0]  %s42_s29, 4096, %s44_s30, [#allocation7], %s1659_s5, %s1659_s5, %s1660_s6  }
   0xb   :  { %1648 = dma.done.wait [#allocation4], 256  }
   0xc   :  { %1649 = vsyncadd [#allocation4], 4294967040 }
   0xd   :  { %1650 = dma.done.wait [#allocation7], 8192  }
   0xe   :  { %1651 = vsyncadd [#allocation7], 4294959104  ;;  %v81_v0 = vld [vmem:[#allocation6 + $0x78] sm:$0xff]  ;;  %v80_v1 = vld [vmem:[#allocation6 + $0x70] sm:$0xff]  ;;  %s1526_s10 = sshll.u32 %s2712_s4, 4  ;;  %s1527_s10 = int_to_ptr.hbm [resolvable:$true] %s1526_s10 }
   0xf   :  { %v79_v2 = vld [vmem:[#allocation6 + $0x68] sm:$0xff]  ;;  %v1696_v3 = vand.u32 4294901760, %v81_v0  ;;  %v1698_v4 = vand.u32 4294901760, %v80_v1  ;;  %v78_v6 = vld [vmem:[#allocation6 + $0x60] sm:$0xff]  ;;  %v77_v7 = vld [vmem:[#allocation6 + $0x58] sm:$0xff] }
  0x10   :  { %v1700_v5 = vand.u32 4294901760, %v79_v2  ;;  %v76_v8 = vld [vmem:[#allocation6 + $0x50] sm:$0xff]  ;;  %v1702_v9 = vand.u32 4294901760, %v78_v6  ;;  %v1704_v10 = vand.u32 4294901760, %v77_v7  ;;  %v75_v12 = vld [vmem:[#allocation6 + $0x48] sm:$0xff]  ;;  %v74_v13 = vld [vmem:[#allocation6 + $0x40] sm:$0xff] }
  0x11   :  { %v1706_v11 = vand.u32 4294901760, %v76_v8  ;;  %101 = vmatpush.msra.mxu0 %v1696_v3  ;;  %v1710_v14 = vsub.f32 %v81_v0, %v1696_v3  ;;  %v1713_v15 = vsub.f32 %v80_v1, %v1698_v4  ;;  %297 = vmatpush.msra.mxu3 %v1696_v3  ;;  %v1719_v17 = vand.u32 4294901760, %v75_v12  ;;  %v73_v21 = vld [vmem:[#allocation6 + $0x38] sm:$0xff]  ;;  %v72_v26 = vld [vmem:[#allocation6 + $0x30] sm:$0xff]  ;;  %v71_v36 = vld [vmem:[#allocation6 + $0x28] sm:$0xff] }
  0x12   :  { %v1717_v16 = vsub.f32 %v79_v2, %v1700_v5  ;;  %v1722_v18 = vsub.f32 %v78_v6, %v1702_v9  ;;  %v1725_v19 = vsub.f32 %v77_v7, %v1704_v10  ;;  %v1735_v25 = vand.u32 4294901760, %v74_v13  ;;  %v70_v42 = vld [vmem:[#allocation6 + $0x20] sm:$0xff]  ;;  %v69_v47 = vld [vmem:[#allocation6 + $0x18] sm:$0xff]  ;;  %v68_v54 = vld [vmem:[#allocation6 + $0x10] sm:$0xff] }
  0x13   :  { %v1728_v20 = vsub.f32 %v76_v8, %v1706_v11  ;;  %103 = vmatpush.msra.mxu0 %v1698_v4  ;;  %244 = vmatpush.msra.mxu2 %v1710_v14  ;;  %v143_v22 = vand.u32 4294901760, %v1710_v14  ;;  %v2728_v23 = vand.u32 4294901760, %v1713_v15  ;;  %v1741_v29 = vsub.f32 %v75_v12, %v1719_v17  ;;  %v97_v59 = vld [vmem:[#allocation6 + $0xf8] sm:$0xff]  ;;  %v67_v61 = vld [vmem:[#allocation6 + $0x8] sm:$0xff]  ;;  %v66_v2 = vld [vmem:[#allocation6] sm:$0xff] }
  0x14   :  { %v2726_v24 = vand.u32 4294901760, %v1717_v16  ;;  %299 = vmatpush.msra.mxu3 %v1698_v4  ;;  %v2725_v27 = vand.u32 4294901760, %v1722_v18  ;;  %v2722_v28 = vand.u32 4294901760, %v1725_v19  ;;  %v1754_v33 = vand.u32 4294901760, %v73_v21  ;;  %v96_v6 = vld [vmem:[#allocation6 + $0xf0] sm:$0xff] }
  0x15   :  { %105 = vmatpush.msra.mxu0 %v1700_v5  ;;  %247 = vmatpush.msra.mxu2 %v1713_v15  ;;  %v144_v30 = vsub.f32 %v1710_v14, %v143_v22  ;;  %v150_v31 = vsub.f32 %v1713_v15, %v2728_v23  ;;  %v1757_v34 = vand.u32 4294901760, %v72_v26  ;;  %v2720_v35 = vand.u32 4294901760, %v1728_v20 }
  0x16   :  { %v156_v32 = vsub.f32 %v1717_v16, %v2726_v24  ;;  %301 = vmatpush.msra.mxu3 %v1700_v5  ;;  %v162_v39 = vsub.f32 %v1722_v18, %v2725_v27  ;;  %v1766_v40 = vsub.f32 %v74_v13, %v1735_v25  ;;  %v168_v41 = vsub.f32 %v1725_v19, %v2722_v28 }
  0x17   :  { %107 = vmatpush.msra.mxu0 %v1702_v9  ;;  %v145_v37 = vand.u32 4294901760, %v144_v30  ;;  %250 = vmatpush.msra.mxu2 %v1717_v16  ;;  %v151_v38 = vand.u32 4294901760, %v150_v31  ;;  %v1773_v44 = vand.u32 4294901760, %v71_v36  ;;  %v2719_v45 = vand.u32 4294901760, %v1741_v29 }
  0x18   :  { %303 = vmatpush.msra.mxu3 %v1702_v9  ;;  %v157_v43 = vand.u32 4294901760, %v156_v32  ;;  %v1777_v46 = vsub.f32 %v73_v21, %v1754_v33  ;;  %v174_v48 = vsub.f32 %v1728_v20, %v2720_v35  ;;  %v163_v49 = vand.u32 4294901760, %v162_v39  ;;  %v95_v32 = vld [vmem:[#allocation6 + $0xe8] sm:$0xff] }
  0x19   :  { %109 = vmatpush.msra.mxu0 %v1704_v10  ;;  %146 = vmatpush.msra.mxu1 %v145_v37  ;;  %v1785_v50 = vand.u32 4294901760, %v70_v42  ;;  %v2718_v51 = vand.u32 4294901760, %v1766_v40  ;;  %v1789_v52 = vsub.f32 %v72_v26, %v1757_v34  ;;  %v1793_v53 = vand.u32 4294901760, %v69_v47 }
  0x1a   :  { %253 = vmatpush.msra.mxu2 %v1722_v18  ;;  %305 = vmatpush.msra.mxu3 %v1704_v10  ;;  %v169_v55 = vand.u32 4294901760, %v168_v41  ;;  %v180_v56 = vsub.f32 %v1741_v29, %v2719_v45  ;;  %v2717_v57 = vand.u32 4294901760, %v1777_v46  ;;  %v1801_v58 = vsub.f32 %v71_v36, %v1773_v44  ;;  %v90_v45 = vld [vmem:[#allocation6 + $0xc0] sm:$0xff] }
  0x1b   :  { %111 = vmatpush.msra.mxu0 %v1706_v11  ;;  %152 = vmatpush.msra.mxu1 %v151_v38  ;;  %v175_v60 = vand.u32 4294901760, %v174_v48  ;;  %v186_v62 = vsub.f32 %v1766_v40, %v2718_v51  ;;  %v1809_v63 = vand.u32 4294901760, %v68_v54  ;;  %v2716_v0 = vand.u32 4294901760, %v1789_v52 }
  0x1c   :  { %256 = vmatpush.msra.mxu2 %v1725_v19  ;;  %307 = vmatpush.msra.mxu3 %v1706_v11  ;;  %v1813_v1 = vsub.f32 %v70_v42, %v1785_v50  ;;  %v1818_v7 = vsub.f32 %v69_v47, %v1793_v53  ;;  %v1820_v8 = vand.u32 4294901760, %v97_v59  ;;  %v181_v12 = vand.u32 4294901760, %v180_v56 }
  0x1d   :  { %113 = vmatpush.msra.mxu0 %v1719_v17  ;;  %158 = vmatpush.msra.mxu1 %v157_v43  ;;  %v192_v13 = vsub.f32 %v1777_v46, %v2717_v57  ;;  %v1826_v21 = vand.u32 4294901760, %v67_v61  ;;  %v2714_v26 = vand.u32 4294901760, %v1801_v58  ;;  %v1831_v30 = vand.u32 4294901760, %v66_v2  ;;  %v94_v43 = vld [vmem:[#allocation6 + $0xe0] sm:$0xff]  ;;  %v91_v57 = vld [vmem:[#allocation6 + $0xc8] sm:$0xff] }
  0x1e   :  { %259 = vmatpush.msra.mxu2 %v1728_v20  ;;  %309 = vmatpush.msra.mxu3 %v1719_v17  ;;  %v1833_v31 = vand.u32 4294901760, %v96_v6  ;;  %v187_v36 = vand.u32 4294901760, %v186_v62  ;;  %v198_v37 = vsub.f32 %v1789_v52, %v2716_v0  ;;  %v2713_v38 = vand.u32 4294901760, %v1813_v1 }
  0x1f   :  { %115 = vmatpush.msra.mxu0 %v1735_v25  ;;  %164 = vmatpush.msra.mxu1 %v163_v49  ;;  %2733 = vst [vmem:[#allocation13_spill] sm:$0xff] %v1831_v30  ;;  %v1841_v39 = vsub.f32 %v68_v54, %v1809_v63  ;;  %v2715_v41 = vand.u32 4294901760, %v1818_v7  ;;  %v1847_v42 = vsub.f32 %v97_v59, %v1820_v8  ;;  %v193_v47 = vand.u32 4294901760, %v192_v13  ;;  %v93_v59 = vld [vmem:[#allocation6 + $0xd8] sm:$0xff]  ;;  %v92_v13 = vld [vmem:[#allocation6 + $0xd0] sm:$0xff] }
  0x20   :  { %262 = vmatpush.msra.mxu2 %v1741_v29  ;;  %311 = vmatpush.msra.mxu3 %v1735_v25  ;;  %v204_v48 = vsub.f32 %v1801_v58, %v2714_v26  ;;  %v1854_v49 = vsub.f32 %v67_v61, %v1826_v21  ;;  %v1856_v54 = vand.u32 4294901760, %v95_v32  ;;  %v1864_v56 = vsub.f32 %v96_v6, %v1833_v31 }
  0x21   :  { %117 = vmatpush.msra.mxu0 %v1754_v33  ;;  %170 = vmatpush.msra.mxu1 %v169_v55  ;;  %v1861_v55 = vsub.f32 %v66_v2, %v1831_v30  ;;  %v210_v61 = vsub.f32 %v1813_v1, %v2713_v38  ;;  %v2721_v62 = vand.u32 4294901760, %v1841_v39  ;;  %v216_v2 = vsub.f32 %v1818_v7, %v2715_v41 }
  0x22   :  { %265 = vmatpush.msra.mxu2 %v1766_v40  ;;  %313 = vmatpush.msra.mxu3 %v1754_v33  ;;  %v2723_v6 = vand.u32 4294901760, %v1847_v42  ;;  %v1882_v38 = vsub.f32 %v95_v32, %v1856_v54  ;;  %v1884_v26 = vand.u32 4294901760, %v93_v59  ;;  %v2727_v0 = vand.u32 4294901760, %v1864_v56 }
  0x23   :  { %119 = vmatpush.msra.mxu0 %v1757_v34  ;;  %176 = vmatpush.msra.mxu1 %v175_v60  ;;  %v199_v60 = vand.u32 4294901760, %v198_v37  ;;  %v2724_v37 = vand.u32 4294901760, %v1854_v49  ;;  %v2729_v41 = vand.u32 4294901760, %v1861_v55  ;;  %v222_v32 = vsub.f32 %v1841_v39, %v2721_v62 }
  0x24   :  { %268 = vmatpush.msra.mxu2 %v1777_v46  ;;  %315 = vmatpush.msra.mxu3 %v1757_v34  ;;  %v1897_v51 = vand.u32 4294901760, %v92_v13  ;;  %v217_v35 = vand.u32 4294901760, %v216_v2  ;;  %v1910_v62 = vsub.f32 %v93_v59, %v1884_v26  ;;  %v1912_v28 = vand.u32 4294901760, %v91_v57  ;;  %v89_v2 = vld [vmem:[#allocation6 + $0xb8] sm:$0xff] }
  0x25   :  { %121 = vmatpush.msra.mxu0 %v1773_v44  ;;  %182 = vmatpush.msra.mxu1 %v181_v12  ;;  %v1871_v12 = vand.u32 4294901760, %v94_v43  ;;  %v234_v59 = vsub.f32 %v1861_v55, %v2729_v41  ;;  %v1932_v23 = vand.u32 4294901760, %v89_v2  ;;  %v2735_v14 = vand.u32 4294901760, %v1713_v15 }
  0x26   :  { %271 = vmatpush.msra.mxu2 %v1789_v52  ;;  %317 = vmatpush.msra.mxu3 %v1773_v44  ;;  %v1927_v24 = vsub.f32 %v92_v13, %v1897_v51  ;;  %v1940_v27 = vsub.f32 %v91_v57, %v1912_v28  ;;  %v2737_v15 = vand.u32 4294901760, %v1717_v16  ;;  %v2739_v16 = vand.u32 4294901760, %v1722_v18 }
  0x27   :  { %123 = vmatpush.msra.mxu0 %v1785_v50  ;;  %188 = vmatpush.msra.mxu1 %v187_v36  ;;  %v205_v36 = vand.u32 4294901760, %v204_v48  ;;  %v1895_v48 = vsub.f32 %v94_v43, %v1871_v12  ;;  %v228_v43 = vsub.f32 %v1854_v49, %v2724_v37  ;;  %v223_v37 = vand.u32 4294901760, %v222_v32 }
  0x28   :  { %274 = vmatpush.msra.mxu2 %v1801_v58  ;;  %319 = vmatpush.msra.mxu3 %v1785_v50  ;;  %v2734_v32 = vand.u32 4294901760, %v1882_v38  ;;  %v2741_v18 = vand.u32 4294901760, %v1725_v19  ;;  %v2743_v19 = vand.u32 4294901760, %v1728_v20  ;;  %v2745_v20 = vand.u32 4294901760, %v1741_v29 }
  0x29   :  { %125 = vmatpush.msra.mxu0 %v1793_v53  ;;  %194 = vmatpush.msra.mxu1 %v193_v47  ;;  %v211_v47 = vand.u32 4294901760, %v210_v61  ;;  %v88_v61 = vld [vmem:[#allocation6 + $0xb0] sm:$0xff]  ;;  %v2747_v29 = vand.u32 4294901760, %v1766_v40  ;;  %v2749_v40 = vand.u32 4294901760, %v1777_v46  ;;  %v2751_v46 = vand.u32 4294901760, %v1789_v52 }
  0x2a   :  { %277 = vmatpush.msra.mxu2 %v1813_v1  ;;  %321 = vmatpush.msra.mxu3 %v1793_v53  ;;  %v497_v41 = vsub.f32 %v1882_v38, %v2734_v32  ;;  %v2736_v32 = vand.u32 4294901760, %v1895_v48 }
  0x2b   :  { %127 = vmatpush.msra.mxu0 %v1809_v63  ;;  %200 = vmatpush.msra.mxu1 %v199_v60  ;;  %v485_v60 = vsub.f32 %v1847_v42, %v2723_v6  ;;  %v1919_v6 = vand.u32 4294901760, %v90_v45 }
  0x2c   :  { %280 = vmatpush.msra.mxu2 %v1818_v7  ;;  %323 = vmatpush.msra.mxu3 %v1809_v63  ;;  %v503_v13 = vsub.f32 %v1895_v48, %v2736_v32 }
  0x2d   :  { %129 = vmatpush.msra.mxu0 %v1826_v21  ;;  %206 = vmatpush.msra.mxu1 %v205_v36  ;;  %v491_v36 = vsub.f32 %v1864_v56, %v2727_v0  ;;  %v486_v0 = vand.u32 4294901760, %v485_v60  ;;  %v87_v60 = vld [vmem:[#allocation6 + $0xa8] sm:$0xff] }
  0x2e   :  { %283 = vmatpush.msra.mxu2 %v1841_v39  ;;  %325 = vmatpush.msra.mxu3 %v1826_v21  ;;  %v1965_v57 = vand.u32 4294901760, %v87_v60 }
  0x2f   :  { %131 = vmatpush.msra.mxu0 %v1831_v30  ;;  %212 = vmatpush.msra.mxu1 %v211_v47  ;;  %v229_v47 = vand.u32 4294901760, %v228_v43  ;;  %v235_v43 = vand.u32 4294901760, %v234_v59  ;;  %v2738_v59 = vand.u32 4294901760, %v1910_v62 }
  0x30   :  { %286 = vmatpush.msra.mxu2 %v1854_v49  ;;  %327 = vmatpush.msra.mxu3 %v1831_v30  ;;  %v1953_v30 = vand.u32 4294901760, %v88_v61 }
  0x31   :  { %338 = vmatpush.msrb.mxu0 %v143_v22  ;;  %218 = vmatpush.msra.mxu1 %v217_v35  ;;  %v492_v22 = vand.u32 4294901760, %v491_v36  ;;  %v1946_v35 = vsub.f32 %v90_v45, %v1919_v6  ;;  %v1958_v45 = vsub.f32 %v89_v2, %v1932_v23  ;;  %v86_v36 = vld [vmem:[#allocation6 + $0xa0] sm:$0xff]  ;;  %v85_v2 = vld [vmem:[#allocation6 + $0x98] sm:$0xff] }
  0x32   :  { %289 = vmatpush.msra.mxu2 %v1861_v55  ;;  %487 = vmatpush.msrb.mxu3 %v486_v0  ;;  %v1977_v32 = vand.u32 4294901760, %v86_v36  ;;  %v1990_v0 = vand.u32 4294901760, %v85_v2 }
  0x33   :  { %342 = vmatpush.msrb.mxu0 %v2735_v14  ;;  %224 = vmatpush.msra.mxu1 %v223_v37  ;;  %v498_v37 = vand.u32 4294901760, %v497_v41  ;;  %v509_v14 = vsub.f32 %v1910_v62, %v2738_v59  ;;  %v2740_v41 = vand.u32 4294901760, %v1927_v24  ;;  %v1975_v59 = vsub.f32 %v88_v61, %v1953_v30 }
  0x34   :  { %442 = vmatpush.msrb.mxu2 %v1820_v8  ;;  %493 = vmatpush.msrb.mxu3 %v492_v22  ;;  %v1988_v61 = vsub.f32 %v87_v60, %v1965_v57  ;;  %v2001_v60 = vsub.f32 %v86_v36, %v1977_v32 }
  0x35   :  { %346 = vmatpush.msrb.mxu0 %v2737_v15  ;;  %230 = vmatpush.msra.mxu1 %v229_v47  ;;  %v504_v47 = vand.u32 4294901760, %v503_v13  ;;  %v515_v15 = vsub.f32 %v1927_v24, %v2740_v41  ;;  %v510_v13 = vand.u32 4294901760, %v509_v14 }
  0x36   :  { %444 = vmatpush.msrb.mxu2 %v1833_v31  ;;  %499 = vmatpush.msrb.mxu3 %v498_v37  ;;  %v84_v37 = vld [vmem:[#allocation6 + $0x90] sm:$0xff] }
  0x37   :  { %350 = vmatpush.msrb.mxu0 %v2739_v16  ;;  %236 = vmatpush.msra.mxu1 %v235_v43  ;;  %v64_v43 = vld [vmem:[#allocation3] sm:$0xff]  ;;  %v2742_v16 = vand.u32 4294901760, %v1940_v27  ;;  %v516_v14 = vand.u32 4294901760, %v515_v15  ;;  %v2013_v36 = vand.u32 4294901760, %v84_v37 }
  0x38   :  { %446 = vmatpush.msrb.mxu2 %v1856_v54  ;;  %505 = vmatpush.msrb.mxu3 %v504_v47  ;;  %v2003_v22 = vand.u32 4294901760, %v64_v43 }
  0x39   :  { %354 = vmatpush.msrb.mxu0 %v2741_v18  ;;  %405 = vmatpush.msrb.mxu1 %v1696_v3  ;;  %v521_v41 = vsub.f32 %v1940_v27, %v2742_v16  ;;  %v2744_v3 = vand.u32 4294901760, %v1946_v35  ;;  %v2016_v16 = vsub.f32 %v85_v2, %v1990_v0 }
  0x3a   :  { %448 = vmatpush.msrb.mxu2 %v1871_v12  ;;  %511 = vmatpush.msrb.mxu3 %v510_v13  ;;  %v2748_v13 = vand.u32 4294901760, %v1975_v59  ;;  %v2027_v15 = vsub.f32 %v64_v43, %v2003_v22  ;;  %v2040_v43 = vsub.f32 %v84_v37, %v2013_v36 }
  0x3b   :  { %358 = vmatpush.msrb.mxu0 %v2743_v19  ;;  %407 = vmatpush.msrb.mxu1 %v1698_v4  ;;  %v527_v18 = vsub.f32 %v1946_v35, %v2744_v3  ;;  %v2746_v4 = vand.u32 4294901760, %v1958_v45  ;;  %v83_v3 = vld [vmem:[#allocation6 + $0x88] sm:$0xff]  ;;  %v522_v47 = vand.u32 4294901760, %v521_v41 }
  0x3c   :  { %450 = vmatpush.msrb.mxu2 %v1884_v26  ;;  %517 = vmatpush.msrb.mxu3 %v516_v14  ;;  %v539_v41 = vsub.f32 %v1975_v59, %v2748_v13  ;;  %v2029_v2 = vand.u32 4294901760, %v83_v3 }
  0x3d   :  { %362 = vmatpush.msrb.mxu0 %v2745_v20  ;;  %409 = vmatpush.msrb.mxu1 %v1700_v5  ;;  %v533_v19 = vsub.f32 %v1958_v45, %v2746_v4  ;;  %v528_v5 = vand.u32 4294901760, %v527_v18  ;;  %v82_v20 = vld [vmem:[#allocation6 + $0x80] sm:$0xff]  ;;  %v550_v4 = vand.u32 4294901760, %v2001_v60  ;;  %v2750_v18 = vand.u32 4294901760, %v1988_v61 }
  0x3e   :  { %452 = vmatpush.msrb.mxu2 %v1897_v51  ;;  %523 = vmatpush.msrb.mxu3 %v522_v47  ;;  %v2042_v13 = vand.u32 4294901760, %v82_v20  ;;  %v134_v47 = vand.u32 4294901760, %v2027_v15  ;;  %v2053_v37 = vsub.f32 %v83_v3, %v2029_v2  ;;  %v2753_v3 = vand.u32 4294901760, %v1813_v1 }
  0x3f   :  { %366 = vmatpush.msrb.mxu0 %v2747_v29  ;;  %411 = vmatpush.msrb.mxu1 %v1702_v9  ;;  %v534_v9 = vand.u32 4294901760, %v533_v19  ;;  %v545_v14 = vsub.f32 %v1988_v61, %v2750_v18  ;;  %v556_v29 = vand.u32 4294901760, %v2016_v16  ;;  %v551_v19 = vsub.f32 %v2001_v60, %v550_v4 }
  0x40   :  { %454 = vmatpush.msrb.mxu2 %v1912_v28  ;;  %529 = vmatpush.msrb.mxu3 %v528_v5  ;;  %v562_v5 = vand.u32 4294901760, %v2040_v43  ;;  %v568_v18 = vand.u32 4294901760, %v2053_v37 }
  0x41   :  { %370 = vmatpush.msrb.mxu0 %v2749_v40  ;;  %413 = vmatpush.msrb.mxu1 %v1704_v10  ;;  %v540_v10 = vand.u32 4294901760, %v539_v41  ;;  %v2752_v40 = vand.u32 4294901760, %v1801_v58  ;;  %v557_v52 = vsub.f32 %v2016_v16, %v556_v29  ;;  %v2064_v41 = vsub.f32 %v82_v20, %v2042_v13  ;;  %v65_v58 = vld [vmem:[#allocation3 + $0x8] sm:$0xff] }
  0x42   :  { %456 = vmatpush.msrb.mxu2 %v1919_v6  ;;  %535 = vmatpush.msrb.mxu3 %v534_v9  ;;  %v135_v9 = vsub.f32 %v2027_v15, %v134_v47 }
  0x43   :  { %374 = vmatpush.msrb.mxu0 %v2751_v46  ;;  %415 = vmatpush.msrb.mxu1 %v1706_v11  ;;  %v546_v11 = vand.u32 4294901760, %v545_v14  ;;  %v2754_v14 = vand.u32 4294901760, %v1818_v7  ;;  %v558_v1 = vand.u32 4294901760, %v557_v52  ;;  %v574_v20 = vand.u32 4294901760, %v2064_v41 }
  0x44   :  { %458 = vmatpush.msrb.mxu2 %v1932_v23  ;;  %541 = vmatpush.msrb.mxu3 %v540_v10  ;;  %v2080_v46 = vand.u32 4294901760, %v65_v58  ;;  %v2755_v10 = vand.u32 4294901760, %v1841_v39  ;;  %v569_v7 = vsub.f32 %v2053_v37, %v568_v18 }
  0x45   :  { %378 = vmatpush.msrb.mxu0 %v2752_v40  ;;  %417 = vmatpush.msrb.mxu1 %v1719_v17  ;;  %v552_v17 = vand.u32 4294901760, %v551_v19  ;;  %v2756_v19 = vand.u32 4294901760, %v1854_v49 }
  0x46   :  { %460 = vmatpush.msrb.mxu2 %v1953_v30  ;;  %547 = vmatpush.msrb.mxu3 %v546_v11  ;;  %v2097_v40 = vsub.f32 %v65_v58, %v2080_v46  ;;  %v2757_v11 = vand.u32 4294901760, %v1861_v55  ;;  %v2760_v55 = vld [vmem:[#allocation13_spill] sm:$0xff] }
  0x47   :  { %382 = vmatpush.msrb.mxu0 %v2753_v3  ;;  %419 = vmatpush.msrb.mxu1 %v1735_v25  ;;  %v563_v25 = vsub.f32 %v2040_v43, %v562_v5 }
  0x48   :  { %462 = vmatpush.msrb.mxu2 %v1965_v57  ;;  %553 = vmatpush.msrb.mxu3 %v552_v17  ;;  %v475_v52 = vand.u32 4294901760, %v2097_v40 }
  0x49   :  { %386 = vmatpush.msrb.mxu0 %v2754_v14  ;;  %421 = vmatpush.msrb.mxu1 %v1754_v33  ;;  %v136_v33 = vand.u32 4294901760, %v135_v9  ;;  %v564_v39 = vand.u32 4294901760, %v563_v25  ;;  %v817_v9 = vld [vmem:[#allocation8 + $0x80] sm:$0xff] }
  0x4a   :  { %464 = vmatpush.msrb.mxu2 %v1977_v32  ;;  %559 = vmatpush.msrb.mxu3 %v558_v1  ;;  %v2271_v25 = vand.u32 4294901760, %v817_v9 }
  0x4b   :  { %390 = vmatpush.msrb.mxu0 %v2755_v10  ;;  %423 = vmatpush.msrb.mxu1 %v1757_v34  ;;  %v575_v34 = vsub.f32 %v2064_v41, %v574_v20 }
  0x4c   :  { %466 = vmatpush.msrb.mxu2 %v1990_v0  ;;  %137 = vmatmul.f32.vlgmr.msra.gmra.mxu0 %v136_v33 }
  0x4d   :  { %394 = vmatpush.msrb.mxu0 %v2756_v19  ;;  %425 = vmatpush.msrb.mxu1 %v1773_v44  ;;  %v570_v44 = vand.u32 4294901760, %v569_v7  ;;  %v576_v49 = vand.u32 4294901760, %v575_v34  ;;  %v2284_v7 = vsub.f32 %v817_v9, %v2271_v25  ;;  %v813_v34 = vld [vmem:[#allocation8 + $0x60] sm:$0xff] }
  0x4e   :  { %468 = vmatpush.msrb.mxu2 %v2013_v36  ;;  %565 = vmatpush.msrb.mxu3 %v564_v39 }
  0x4f   :  { %398 = vmatpush.msrb.mxu0 %v2757_v11  ;;  %427 = vmatpush.msrb.mxu1 %v1785_v50  ;;  %v2758_v50 = vand.u32 4294901760, %v1847_v42 }
  0x50   :  { %470 = vmatpush.msrb.mxu2 %v2029_v2  ;;  %571 = vmatpush.msrb.mxu3 %v570_v44  ;;  %v918_v44 = vand.u32 4294901760, %v2284_v7 }
  0x51   :  { %585 = vmatpush.msra.mxu0 %v1847_v42  ;;  %429 = vmatpush.msrb.mxu1 %v1793_v53  ;;  %v476_v53 = vsub.f32 %v2097_v40, %v475_v52 }
  0x52   :  { %472 = vmatpush.msrb.mxu2 %v2042_v13  ;;  %577 = vmatpush.msrb.mxu3 %v576_v49 }
  0x53   :  { %588 = vmatpush.msra.mxu0 %v1864_v56  ;;  %431 = vmatpush.msrb.mxu1 %v1809_v63  ;;  %v2759_v63 = vand.u32 4294901760, %v1864_v56  ;;  %v477_v42 = vand.u32 4294901760, %v476_v53  ;;  %v2762_v56 = vand.u32 4294901760, %v1895_v48 }
  0x54   :  { %292 = vmatmul.f32.vlgmr.msra.gmra.mxu2 %v2027_v15  ;;  %331 = vmatmul.f32.vlgmr.msra.gmra.mxu3 %v134_v47 }
  0x55   :  { %591 = vmatpush.msra.mxu0 %v1882_v38  ;;  %679 = vmatpush.msra.mxu2 %v2758_v50  ;;  %v811_v50 = vld [vmem:[#allocation8 + $0x50] sm:$0xff] }
  0x56   :  { %433 = vmatpush.msrb.mxu1 %v1826_v21  ;;  %746 = vmatpush.msra.mxu3 %v1820_v8  ;;  %v2761_v21 = vand.u32 4294901760, %v1882_v38  ;;  %v2763_v38 = vand.u32 4294901760, %v1910_v62 }
  0x57   :  { %594 = vmatpush.msra.mxu0 %v1895_v48  ;;  %683 = vmatpush.msra.mxu2 %v2759_v63  ;;  %v919_v63 = vsub.f32 %v2284_v7, %v918_v44 }
  0x58   :  { %435 = vmatpush.msrb.mxu1 %v2760_v55  ;;  %748 = vmatpush.msra.mxu3 %v1833_v31 }
  0x59   :  { %597 = vmatpush.msra.mxu0 %v1910_v62  ;;  %238 = vmatmul.f32.vlgmr.msra.gmra.mxu1 %v2003_v22 }
  0x5a   :  { %687 = vmatpush.msra.mxu2 %v2761_v21  ;;  %638 = vmatpush.msra.mxu1 %v1820_v8  ;;  %v2764_v8 = vand.u32 4294901760, %v1927_v24  ;;  %v2306_v21 = vand.u32 4294901760, %v811_v50 }
  0x5b   :  { %600 = vmatpush.msra.mxu0 %v1927_v24  ;;  %750 = vmatpush.msra.mxu3 %v1856_v54  ;;  %v2766_v24 = vand.u32 4294901760, %v1946_v35 }
  0x5c   :  { %691 = vmatpush.msra.mxu2 %v2762_v56  ;;  %640 = vmatpush.msra.mxu1 %v1833_v31  ;;  %v2765_v31 = vand.u32 4294901760, %v1940_v27  ;;  %v809_v56 = vld [vmem:[#allocation8 + $0x40] sm:$0xff] }
  0x5d   :  { %478 = vmatmul.f32.vlgmr.msrb.gmra.mxu2 %v477_v42  ;;  %603 = vmatpush.msra.mxu0 %v1940_v27  ;;  %v2768_v27 = vand.u32 4294901760, %v1975_v59 }
  0x5e   :  { %642 = vmatpush.msra.mxu1 %v1856_v54  ;;  %695 = vmatpush.msra.mxu2 %v2763_v38  ;;  %v920_v38 = vand.u32 4294901760, %v919_v63 }
  0x5f   :  { %752 = vmatpush.msra.mxu3 %v1871_v12  ;;  %400 = vmatmul.f32.vlgmr.msrb.gmra.mxu0 %v2003_v22 }
  0x60   :  { %579 = vmatmul.f32.vlgmr.msrb.gmra.mxu3 %v2080_v46  ;;  %606 = vmatpush.msra.mxu0 %v1946_v35 }
  0x61   :  { %644 = vmatpush.msra.mxu1 %v1871_v12  ;;  %699 = vmatpush.msra.mxu2 %v2764_v8  ;;  %v827_v12 = vld [vmem:[#allocation8 + $0xd0] sm:$0xff] }
  0x62   :  { %754 = vmatpush.msra.mxu3 %v1884_v26  ;;  %437 = vmatmul.f32.vlgmr.msrb.gmra.mxu1 %v2003_v22  ;;  %v2216_v35 = vand.u32 4294901760, %v827_v12  ;;  %v823_v22 = vld [vmem:[#allocation8 + $0xb0] sm:$0xff] }
  0x63   :  { %609 = vmatpush.msra.mxu0 %v1958_v45  ;;  %646 = vmatpush.msra.mxu1 %v1884_v26  ;;  %v2767_v26 = vand.u32 4294901760, %v1958_v45 }
  0x64   :  { %703 = vmatpush.msra.mxu2 %v2765_v31  ;;  %756 = vmatpush.msra.mxu3 %v1897_v51  ;;  %v2318_v31 = vsub.f32 %v811_v50, %v2306_v21 }
  0x65   :  { %612 = vmatpush.msra.mxu0 %v1975_v59  ;;  %648 = vmatpush.msra.mxu1 %v1897_v51 }
  0x66   :  { %707 = vmatpush.msra.mxu2 %v2766_v24  ;;  %758 = vmatpush.msra.mxu3 %v1912_v28  ;;  %v2320_v24 = vand.u32 4294901760, %v809_v56 }
  0x67   :  { %615 = vmatpush.msra.mxu0 %v1988_v61  ;;  %650 = vmatpush.msra.mxu1 %v1912_v28  ;;  %v2769_v28 = vand.u32 4294901760, %v1988_v61 }
  0x68   :  { %711 = vmatpush.msra.mxu2 %v2767_v26  ;;  %760 = vmatpush.msra.mxu3 %v1919_v6 }
  0x69   :  { %618 = vmatpush.msra.mxu0 %v2001_v60  ;;  %652 = vmatpush.msra.mxu1 %v1919_v6 }
  0x6a   :  { %715 = vmatpush.msra.mxu2 %v2768_v27  ;;  %762 = vmatpush.msra.mxu3 %v1932_v23  ;;  %v807_v27 = vld [vmem:[#allocation8 + $0x30] sm:$0xff] }
  0x6b   :  { %621 = vmatpush.msra.mxu0 %v2016_v16  ;;  %654 = vmatpush.msra.mxu1 %v1932_v23  ;;  %v831_v23 = vld [vmem:[#allocation8 + $0xf0] sm:$0xff] }
  0x6c   :  { %719 = vmatpush.msra.mxu2 %v2769_v28  ;;  %764 = vmatpush.msra.mxu3 %v1953_v30  ;;  %v2202_v51 = vand.u32 4294901760, %v831_v23 }
  0x6d   :  { %624 = vmatpush.msra.mxu0 %v2040_v43  ;;  %656 = vmatpush.msra.mxu1 %v1953_v30  ;;  %v829_v30 = vld [vmem:[#allocation8 + $0xe0] sm:$0xff] }
  0x6e   :  { %723 = vmatpush.msra.mxu2 %v550_v4  ;;  %766 = vmatpush.msra.mxu3 %v1965_v57  ;;  %v2205_v54 = vsub.f32 %v831_v23, %v2202_v51  ;;  %v2207_v62 = vand.u32 4294901760, %v829_v30  ;;  %v821_v4 = vld [vmem:[#allocation8 + $0xa0] sm:$0xff]  ;;  %v936_v23 = vand.u32 4294901760, %v2318_v31 }
  0x6f   :  { %627 = vmatpush.msra.mxu0 %v2053_v37  ;;  %658 = vmatpush.msra.mxu1 %v1965_v57  ;;  %v825_v57 = vld [vmem:[#allocation8 + $0xc0] sm:$0xff]  ;;  %v819_v37 = vld [vmem:[#allocation8 + $0x90] sm:$0xff] }
  0x70   :  { %727 = vmatpush.msra.mxu2 %v556_v29  ;;  %768 = vmatpush.msra.mxu3 %v1977_v32  ;;  %v876_v6 = vand.u32 4294901760, %v2205_v54  ;;  %v2213_v48 = vsub.f32 %v829_v30, %v2207_v62  ;;  %v2228_v59 = vand.u32 4294901760, %v825_v57  ;;  %v2262_v58 = vand.u32 4294901760, %v819_v37 }
  0x71   :  { %630 = vmatpush.msra.mxu0 %v2064_v41  ;;  %660 = vmatpush.msra.mxu1 %v1977_v32  ;;  %v2328_v30 = vsub.f32 %v809_v56, %v2320_v24 }
  0x72   :  { %731 = vmatpush.msra.mxu2 %v562_v5  ;;  %770 = vmatpush.msra.mxu3 %v1990_v0  ;;  %v877_v45 = vsub.f32 %v2205_v54, %v876_v6  ;;  %v882_v32 = vand.u32 4294901760, %v2213_v48  ;;  %v2237_v15 = vsub.f32 %v825_v57, %v2228_v59  ;;  %v2269_v1 = vsub.f32 %v819_v37, %v2262_v58 }
  0x73   :  { %633 = vmatmul.f32.vlgmr.msra.gmra.mxu0 %v2097_v40  ;;  %662 = vmatpush.msra.mxu1 %v1990_v0  ;;  %v2225_v0 = vsub.f32 %v827_v12, %v2216_v35  ;;  %v2336_v57 = vand.u32 4294901760, %v807_v27 }
  0x74   :  { %735 = vmatpush.msra.mxu2 %v568_v18  ;;  %772 = vmatpush.msra.mxu3 %v2013_v36  ;;  %v878_v61 = vand.u32 4294901760, %v877_v45  ;;  %v883_v16 = vsub.f32 %v2213_v48, %v882_v32  ;;  %v894_v43 = vand.u32 4294901760, %v2237_v15  ;;  %v912_v33 = vand.u32 4294901760, %v2269_v1  ;;  %v805_v45 = vld [vmem:[#allocation8 + $0x20] sm:$0xff] }
  0x75   :  { %664 = vmatpush.msra.mxu1 %v2013_v36  ;;  %834 = vmatpush.msrb.mxu0 %v2202_v51  ;;  %v888_v60 = vand.u32 4294901760, %v2225_v0  ;;  %v2241_v36 = vand.u32 4294901760, %v823_v22 }
  0x76   :  { %739 = vmatpush.msra.mxu2 %v574_v20  ;;  %774 = vmatpush.msra.mxu3 %v2029_v2  ;;  %v895_v41 = vsub.f32 %v2237_v15, %v894_v43  ;;  %v913_v11 = vsub.f32 %v2269_v1, %v912_v33 }
  0x77   :  { %741 = vmatmul.f32.vlgmr.msra.gmra.mxu2 %v2080_v46  ;;  %666 = vmatpush.msra.mxu1 %v2029_v2  ;;  %v884_v2 = vand.u32 4294901760, %v883_v16  ;;  %v889_v29 = vsub.f32 %v2225_v0, %v888_v60  ;;  %v2252_v47 = vsub.f32 %v823_v22, %v2241_v36  ;;  %v937_v22 = vsub.f32 %v2318_v31, %v936_v23 }
  0x78   :  { %776 = vmatpush.msra.mxu3 %v2042_v13  ;;  %977 = vmatpush.msrb.mxu2 %v2205_v54  ;;  %v896_v18 = vand.u32 4294901760, %v895_v41  ;;  %v914_v53 = vand.u32 4294901760, %v913_v11  ;;  %v2342_v16 = vand.u32 4294901760, %v805_v45 }
  0x79   :  { %778 = vmatmul.f32.vlgmr.msra.gmra.mxu3 %v2080_v46  ;;  %668 = vmatpush.msra.mxu1 %v2042_v13  ;;  %v2249_v13 = vand.u32 4294901760, %v821_v4  ;;  %v890_v5 = vand.u32 4294901760, %v889_v29  ;;  %v900_v17 = vand.u32 4294901760, %v2252_v47  ;;  %v815_v46 = vld [vmem:[#allocation8 + $0x70] sm:$0xff]  ;;  %v938_v37 = vand.u32 4294901760, %v937_v22 }
  0x7a   :  { %672 = vmatmul.f32.vlgmr.msra.gmra.mxu1 %v475_v52  ;;  %1030 = vmatpush.msrb.mxu3 %v2202_v51  ;;  %v2286_v19 = vand.u32 4294901760, %v815_v46  ;;  %v2300_v52 = vand.u32 4294901760, %v813_v34  ;;  %v803_v29 = vld [vmem:[#allocation8 + $0x10] sm:$0xff]  ;;  %v2354_v41 = vsub.f32 %v805_v45, %v2342_v16  ;;  %v832_v45 = vld [vmem:[#allocation8 + $0xf8] sm:$0xff] }
  0x7b   :  { %836 = vmatpush.msrb.mxu0 %v2207_v62  ;;  %980 = vmatpush.msrb.mxu2 %v2213_v48  ;;  %v2260_v3 = vsub.f32 %v821_v4, %v2249_v13  ;;  %v901_v20 = vsub.f32 %v2252_v47, %v900_v17  ;;  %v2356_v9 = vand.u32 4294901760, %v803_v29 }
  0x7c   :  { %1032 = vmatpush.msrb.mxu3 %v2207_v62  ;;  %879 = vmatpush.msrb.mxu1 %v878_v61  ;;  %v2296_v49 = vsub.f32 %v815_v46, %v2286_v19  ;;  %v2311_v42 = vsub.f32 %v813_v34, %v2300_v52  ;;  %v942_v61 = vand.u32 4294901760, %v2328_v30 }
  0x7d   :  { %838 = vmatpush.msrb.mxu0 %v2216_v35  ;;  %983 = vmatpush.msrb.mxu2 %v2225_v0  ;;  %v906_v14 = vand.u32 4294901760, %v2260_v3  ;;  %v902_v39 = vand.u32 4294901760, %v901_v20  ;;  %v801_v20 = vld [vmem:[#allocation8] sm:$0xff] }
  0x7e   :  { %1034 = vmatpush.msrb.mxu3 %v2216_v35  ;;  %885 = vmatpush.msrb.mxu1 %v884_v2  ;;  %v924_v55 = vand.u32 4294901760, %v2296_v49  ;;  %v930_v26 = vand.u32 4294901760, %v2311_v42  ;;  %v2347_v2 = vsub.f32 %v807_v27, %v2336_v57  ;;  %v2366_v34 = vand.u32 4294901760, %v801_v20 }
  0x7f   :  { %840 = vmatpush.msrb.mxu0 %v2228_v59  ;;  %986 = vmatpush.msrb.mxu2 %v2237_v15  ;;  %v907_v10 = vsub.f32 %v2260_v3, %v906_v14 }
  0x80   :  { %1036 = vmatpush.msrb.mxu3 %v2228_v59  ;;  %891 = vmatpush.msrb.mxu1 %v890_v5  ;;  %v925_v8 = vsub.f32 %v2296_v49, %v924_v55  ;;  %v931_v12 = vsub.f32 %v2311_v42, %v930_v26  ;;  %v943_v5 = vsub.f32 %v2328_v30, %v942_v61 }
  0x81   :  { %842 = vmatpush.msrb.mxu0 %v2241_v36  ;;  %989 = vmatpush.msrb.mxu2 %v2252_v47  ;;  %v908_v40 = vand.u32 4294901760, %v907_v10  ;;  %v954_v10 = vand.u32 4294901760, %v2354_v41  ;;  %v2382_v56 = vsub.f32 %v801_v20, %v2366_v34  ;;  %v820_v47 = vld [vmem:[#allocation8 + $0x98] sm:$0xff] }
  0x82   :  { %1038 = vmatpush.msrb.mxu3 %v2241_v36  ;;  %897 = vmatpush.msrb.mxu1 %v896_v18  ;;  %v926_v28 = vand.u32 4294901760, %v925_v8  ;;  %v932_v4 = vand.u32 4294901760, %v931_v12  ;;  %v948_v18 = vand.u32 4294901760, %v2347_v2  ;;  %v944_v46 = vand.u32 4294901760, %v943_v5  ;;  %v830_v5 = vld [vmem:[#allocation8 + $0xe8] sm:$0xff] }
  0x83   :  { %844 = vmatpush.msrb.mxu0 %v2249_v13  ;;  %992 = vmatpush.msrb.mxu2 %v2260_v3  ;;  %v966_v12 = vand.u32 4294901760, %v2382_v56 }
  0x84   :  { %1040 = vmatpush.msrb.mxu3 %v2249_v13  ;;  %903 = vmatpush.msrb.mxu1 %v902_v39  ;;  %v2364_v39 = vsub.f32 %v803_v29, %v2356_v9  ;;  %v949_v50 = vsub.f32 %v2347_v2, %v948_v18 }
  0x85   :  { %846 = vmatpush.msrb.mxu0 %v2262_v58  ;;  %995 = vmatpush.msrb.mxu2 %v2269_v1 }
  0x86   :  { %1042 = vmatpush.msrb.mxu3 %v2262_v58  ;;  %909 = vmatpush.msrb.mxu1 %v908_v40  ;;  %v99_v40 = vstv %s2711_s3  ;;  %v960_v63 = vand.u32 4294901760, %v2364_v39  ;;  %s1661_s3 = smov [#allocation9]  }
  0x87   :  { %848 = vmatpush.msrb.mxu0 %v2271_v25  ;;  %998 = vmatpush.msrb.mxu2 %v2284_v7  ;;  %s1524_s7 = sshll.u32 %s1661_s3, 4  ;;  %s1525_s7 = int_to_ptr.vmem [resolvable:$true] %s1524_s7 }
  0x88   :  { %1044 = vmatpush.msrb.mxu3 %v2271_v25  ;;  %915 = vmatpush.msrb.mxu1 %v914_v53  ;;  %v955_v53 = vsub.f32 %v2354_v41, %v954_v10 }
  0x89   :  { %850 = vmatpush.msrb.mxu0 %v2286_v19  ;;  %1001 = vmatpush.msrb.mxu2 %v2296_v49 }
  0x8a   :  { %1046 = vmatpush.msrb.mxu3 %v2286_v19  ;;  %921 = vmatpush.msrb.mxu1 %v920_v38  ;;  %v950_v38 = vand.u32 4294901760, %v949_v50  ;;  %v956_v27 = vand.u32 4294901760, %v955_v53  ;;  %v828_v50 = vld [vmem:[#allocation8 + $0xd8] sm:$0xff] }
  0x8b   :  { %852 = vmatpush.msrb.mxu0 %v2300_v52  ;;  %1004 = vmatpush.msrb.mxu2 %v2311_v42 }
  0x8c   :  { %1048 = vmatpush.msrb.mxu3 %v2300_v52  ;;  %927 = vmatpush.msrb.mxu1 %v926_v28  ;;  %v961_v28 = vsub.f32 %v2364_v39, %v960_v63 }
  0x8d   :  { %854 = vmatpush.msrb.mxu0 %v2306_v21  ;;  %1007 = vmatpush.msrb.mxu2 %v2318_v31 }
  0x8e   :  { %1050 = vmatpush.msrb.mxu3 %v2306_v21  ;;  %933 = vmatpush.msrb.mxu1 %v932_v4  ;;  %v2394_v4 = vand.u32 4294901760, %v832_v45  ;;  %v962_v29 = vand.u32 4294901760, %v961_v28 }
  0x8f   :  { %856 = vmatpush.msrb.mxu0 %v2320_v24  ;;  %1010 = vmatpush.msrb.mxu2 %v2328_v30 }
  0x90   :  { %1052 = vmatpush.msrb.mxu3 %v2320_v24  ;;  %939 = vmatpush.msrb.mxu1 %v938_v37  ;;  %v967_v37 = vsub.f32 %v2382_v56, %v966_v12  ;;  %v2403_v20 = vsub.f32 %v832_v45, %v2394_v4 }
  0x91   :  { %858 = vmatpush.msrb.mxu0 %v2336_v57  ;;  %1013 = vmatpush.msrb.mxu2 %v2347_v2 }
  0x92   :  { %1054 = vmatpush.msrb.mxu3 %v2336_v57  ;;  %945 = vmatpush.msrb.mxu1 %v944_v46  ;;  %v2405_v46 = vand.u32 4294901760, %v830_v5  ;;  %v1217_v54 = vand.u32 4294901760, %v2403_v20 }
  0x93   :  { %860 = vmatpush.msrb.mxu0 %v2342_v16  ;;  %1016 = vmatpush.msrb.mxu2 %v2354_v41 }
  0x94   :  { %1056 = vmatpush.msrb.mxu3 %v2342_v16  ;;  %951 = vmatpush.msrb.mxu1 %v950_v38  ;;  %v2414_v38 = vsub.f32 %v830_v5, %v2405_v46  ;;  %v1218_v48 = vsub.f32 %v2403_v20, %v1217_v54 }
  0x95   :  { %862 = vmatpush.msrb.mxu0 %v2356_v9  ;;  %1019 = vmatpush.msrb.mxu2 %v2364_v39 }
  0x96   :  { %1058 = vmatpush.msrb.mxu3 %v2356_v9  ;;  %957 = vmatpush.msrb.mxu1 %v956_v27  ;;  %v826_v27 = vld [vmem:[#allocation8 + $0xc8] sm:$0xff] }
  0x97   :  { %864 = vmatpush.msrb.mxu0 %v2366_v34  ;;  %1022 = vmatpush.msrb.mxu2 %v2382_v56 }
  0x98   :  { %1060 = vmatpush.msrb.mxu3 %v2366_v34  ;;  %963 = vmatpush.msrb.mxu1 %v962_v29 }
  0x99   :  { %1071 = vmatpush.msra.mxu0 %v876_v6  ;;  %1175 = vmatpush.msra.mxu2 %v2394_v4  ;;  %v2411_v6 = vand.u32 4294901760, %v828_v50 }
  0x9b   :  { %1075 = vmatpush.msra.mxu0 %v882_v32  ;;  %1177 = vmatpush.msra.mxu2 %v2405_v46  ;;  %v1223_v32 = vand.u32 4294901760, %v2414_v38  ;;  %v2426_v28 = vsub.f32 %v828_v50, %v2411_v6 }
  0x9d   :  { %1079 = vmatpush.msra.mxu0 %v888_v60  ;;  %1179 = vmatpush.msra.mxu2 %v2411_v6  ;;  %v1219_v60 = vand.u32 4294901760, %v1218_v48  ;;  %v1224_v29 = vsub.f32 %v2414_v38, %v1223_v32  ;;  %v2455_v48 = vand.u32 4294901760, %v820_v47 }
  0x9f   :  { %1083 = vmatpush.msra.mxu0 %v894_v43  ;;  %1220 = vmatpush.msra.mxu3 %v1219_v60  ;;  %v1225_v15 = vand.u32 4294901760, %v1224_v29 }
  0xa1   :  { %1087 = vmatpush.msra.mxu0 %v900_v17  ;;  %1226 = vmatpush.msra.mxu3 %v1225_v15  ;;  %v816_v15 = vld [vmem:[#allocation8 + $0x78] sm:$0xff] }
  0xa2   :  { %v2485_v1 = vand.u32 4294901760, %v816_v15 }
  0xa3   :  { %1091 = vmatpush.msra.mxu0 %v906_v14 }
  0xa5   :  { %1095 = vmatpush.msra.mxu0 %v912_v33 }
  0xa7   :  { %1099 = vmatpush.msra.mxu0 %v918_v44  ;;  %v812_v44 = vld [vmem:[#allocation8 + $0x58] sm:$0xff] }
  0xa9   :  { %1103 = vmatpush.msra.mxu0 %v924_v55  ;;  %v810_v55 = vld [vmem:[#allocation8 + $0x48] sm:$0xff] }
  0xab   :  { %1107 = vmatpush.msra.mxu0 %v930_v26  ;;  %v808_v26 = vld [vmem:[#allocation8 + $0x38] sm:$0xff] }
  0xac   :  { %v2537_v31 = vand.u32 4294901760, %v808_v26 }
  0xad   :  { %1111 = vmatpush.msra.mxu0 %v936_v23 }
  0xaf   :  { %1115 = vmatpush.msra.mxu0 %v942_v61 }
  0xb1   :  { %1119 = vmatpush.msra.mxu0 %v948_v18 }
  0xb3   :  { %1123 = vmatpush.msra.mxu0 %v954_v10 }
  0xb5   :  { %1127 = vmatpush.msra.mxu0 %v960_v63 }
  0xb7   :  { %1131 = vmatpush.msra.mxu0 %v966_v12 }
  0xc9   :  { %v138_v11 = vpop.f32.mrf.mxu0 }
  0xca   :  { %v139_v8 = vadd.f32 %v138_v11, %v99_v40  ;;  %v968_v11 = vand.u32 4294901760, %v967_v37  ;;  %v1229_v37 = vand.u32 4294901760, %v2426_v28 }
  0xcc   :  { %969 = vmatpush.msrb.mxu1 %v968_v11  ;;  %v1230_v43 = vsub.f32 %v2426_v28, %v1229_v37 }
  0xce   :  { %1138 = vmatpush.msra.mxu1 %v2202_v51 }
  0xd0   :  { %1140 = vmatpush.msra.mxu1 %v2207_v62 }
  0xd2   :  { %1142 = vmatpush.msra.mxu1 %v2216_v35 }
  0xd4   :  { %1144 = vmatpush.msra.mxu1 %v2228_v59 }
  0xd6   :  { %v239_v22 = vpop.f32.mrf.mxu1  ;;  %1146 = vmatpush.msra.mxu1 %v2241_v36 }
  0xd7   :  { %v240_v40 = vadd.f32 %v239_v22, %v139_v8  ;;  %v293_v53 = vpop.f32.mrf.mxu2  ;;  %v2423_v8 = vand.u32 4294901760, %v826_v27  ;;  %v824_v22 = vld [vmem:[#allocation8 + $0xb8] sm:$0xff]  ;;  %v332_v0 = vpop.f32.mrf.mxu3 }
  0xd8   :  { %v2437_v5 = vand.u32 4294901760, %v824_v22  ;;  %1148 = vmatpush.msra.mxu1 %v2249_v13  ;;  %v2504_v13 = vsub.f32 %v816_v15, %v2485_v1 }
  0xd9   :  { %v294_v45 = vadd.f32 %v293_v53, %v240_v40  ;;  %1181 = vmatpush.msra.mxu2 %v2423_v8  ;;  %v2440_v51 = vsub.f32 %v826_v27, %v2423_v8  ;;  %v822_v40 = vld [vmem:[#allocation8 + $0xa8] sm:$0xff]  ;;  %v1231_v27 = vand.u32 4294901760, %v1230_v43 }
  0xda   :  { %v2447_v11 = vand.u32 4294901760, %v822_v40  ;;  %v2453_v53 = vsub.f32 %v824_v22, %v2437_v5  ;;  %v818_v22 = vld [vmem:[#allocation8 + $0x88] sm:$0xff]  ;;  %1150 = vmatpush.msra.mxu1 %v2262_v58  ;;  %v1265_v58 = vand.u32 4294901760, %v2504_v13 }
  0xdb   :  { %v333_v50 = vadd.f32 %v332_v0, %v294_v45  ;;  %1183 = vmatpush.msra.mxu2 %v2437_v5  ;;  %v1235_v62 = vand.u32 4294901760, %v2440_v51  ;;  %1232 = vmatpush.msra.mxu3 %v1231_v27  ;;  %v2469_v29 = vand.u32 4294901760, %v818_v22 }
  0xdc   :  { %v401_v17 = vpop.f32.mrf.mxu0  ;;  %v2458_v60 = vsub.f32 %v822_v40, %v2447_v11  ;;  %v2732_v45 = vand.u32 4294901760, %v2453_v53  ;;  %v2472_v40 = vsub.f32 %v820_v47, %v2455_v48  ;;  %1152 = vmatpush.msra.mxu1 %v2271_v25  ;;  %v1266_v25 = vsub.f32 %v2504_v13, %v1265_v58 }
  0xdd   :  { %v1236_v35 = vsub.f32 %v2440_v51, %v1235_v62  ;;  %1185 = vmatpush.msra.mxu2 %v2447_v11  ;;  %v402_v59 = vadd.f32 %v401_v17, %v333_v50  ;;  %v2488_v33 = vsub.f32 %v818_v22, %v2469_v29  ;;  %v814_v50 = vld [vmem:[#allocation8 + $0x68] sm:$0xff] }
  0xde   :  { %v2731_v0 = vand.u32 4294901760, %v2458_v60  ;;  %v1242_v14 = vsub.f32 %v2453_v53, %v2732_v45  ;;  %v1253_v27 = vand.u32 4294901760, %v2472_v40  ;;  %v2498_v45 = vand.u32 4294901760, %v814_v50  ;;  %1154 = vmatpush.msra.mxu1 %v2286_v19 }
  0xdf   :  { %v1237_v3 = vand.u32 4294901760, %v1236_v35  ;;  %1187 = vmatpush.msra.mxu2 %v2455_v48  ;;  %v438_v43 = vpop.f32.mrf.mxu1  ;;  %v1267_v19 = vand.u32 4294901760, %v1266_v25 }
  0xe0   :  { %v1248_v47 = vsub.f32 %v2458_v60, %v2731_v0  ;;  %v1243_v36 = vand.u32 4294901760, %v1242_v14  ;;  %v1254_v35 = vsub.f32 %v2472_v40, %v1253_v27  ;;  %v1259_v0 = vand.u32 4294901760, %v2488_v33  ;;  %v479_v22 = vpop.f32.mrf.mxu2  ;;  %1156 = vmatpush.msra.mxu1 %v2300_v52 }
  0xe1   :  { %1238 = vmatpush.msra.mxu3 %v1237_v3  ;;  %1189 = vmatpush.msra.mxu2 %v2469_v29  ;;  %v439_v7 = vadd.f32 %v438_v43, %v402_v59  ;;  %v2513_v49 = vsub.f32 %v814_v50, %v2498_v45  ;;  %v2521_v43 = vand.u32 4294901760, %v810_v55  ;;  %v2556_v52 = vsub.f32 %v808_v26, %v2537_v31 }
  0xe2   :  { %v1249_v17 = vand.u32 4294901760, %v1248_v47  ;;  %v1255_v3 = vand.u32 4294901760, %v1254_v35  ;;  %v1260_v14 = vsub.f32 %v2488_v33, %v1259_v0  ;;  %v2510_v47 = vand.u32 4294901760, %v812_v44  ;;  %1158 = vmatpush.msra.mxu1 %v2306_v21 }
  0xe3   :  { %1244 = vmatpush.msra.mxu3 %v1243_v36  ;;  %1191 = vmatpush.msra.mxu2 %v2485_v1  ;;  %v1271_v15 = vand.u32 4294901760, %v2513_v49  ;;  %v480_v42 = vadd.f32 %v479_v22, %v439_v7  ;;  %v580_v50 = vpop.f32.mrf.mxu3  ;;  %v2540_v23 = vsub.f32 %v810_v55, %v2521_v43  ;;  %v806_v7 = vld [vmem:[#allocation8 + $0x28] sm:$0xff]  ;;  %v804_v55 = vld [vmem:[#allocation8 + $0x18] sm:$0xff]  ;;  %v1289_v21 = vand.u32 4294901760, %v2556_v52 }
  0xe4   :  { %v1261_v59 = vand.u32 4294901760, %v1260_v14  ;;  %v2524_v36 = vsub.f32 %v812_v44, %v2510_v47  ;;  %v2550_v14 = vand.u32 4294901760, %v806_v7  ;;  %1160 = vmatpush.msra.mxu1 %v2320_v24 }
  0xe5   :  { %1250 = vmatpush.msra.mxu3 %v1249_v17  ;;  %1193 = vmatpush.msra.mxu2 %v2498_v45  ;;  %v1272_v17 = vsub.f32 %v2513_v49, %v1271_v15  ;;  %v581_v30 = vadd.f32 %v580_v50, %v480_v42  ;;  %v802_v50 = vld [vmem:[#allocation8 + $0x8] sm:$0xff]  ;;  %v1290_v24 = vsub.f32 %v2556_v52, %v1289_v21 }
  0xe6   :  { %v1277_v35 = vand.u32 4294901760, %v2524_v36  ;;  %v2565_v2 = vsub.f32 %v806_v7, %v2550_v14  ;;  %1162 = vmatpush.msra.mxu1 %v2336_v57  ;;  %v2579_v41 = vand.u32 4294901760, %v802_v50 }
  0xe7   :  { %1256 = vmatpush.msra.mxu3 %v1255_v3  ;;  %1195 = vmatpush.msra.mxu2 %v2510_v47  ;;  %v1273_v44 = vand.u32 4294901760, %v1272_v17  ;;  %v1283_v3 = vand.u32 4294901760, %v2540_v23  ;;  %v2562_v17 = vand.u32 4294901760, %v804_v55  ;;  %v1291_v57 = vand.u32 4294901760, %v1290_v24 }
  0xe8   :  { %v1278_v22 = vsub.f32 %v2524_v36, %v1277_v35  ;;  %v1295_v26 = vand.u32 4294901760, %v2565_v2  ;;  %1164 = vmatpush.msra.mxu1 %v2342_v16 }
  0xe9   :  { %1262 = vmatpush.msra.mxu3 %v1261_v59  ;;  %1197 = vmatpush.msra.mxu2 %v2521_v43  ;;  %v1284_v25 = vsub.f32 %v2540_v23, %v1283_v3  ;;  %v2582_v10 = vsub.f32 %v804_v55, %v2562_v17 }
  0xea   :  { %v1279_v59 = vand.u32 4294901760, %v1278_v22  ;;  %v1296_v39 = vsub.f32 %v2565_v2, %v1295_v26  ;;  %1166 = vmatpush.msra.mxu1 %v2356_v9 }
  0xeb   :  { %1268 = vmatpush.msra.mxu3 %v1267_v19  ;;  %1199 = vmatpush.msra.mxu2 %v2537_v31  ;;  %v1285_v42 = vand.u32 4294901760, %v1284_v25  ;;  %v1301_v63 = vand.u32 4294901760, %v2582_v10 }
  0xec   :  { %1168 = vmatpush.msra.mxu1 %v2366_v34 }
  0xed   :  { %1274 = vmatpush.msra.mxu3 %v1273_v44  ;;  %1201 = vmatpush.msra.mxu2 %v2550_v14  ;;  %v2593_v44 = vsub.f32 %v802_v50, %v2579_v41  ;;  %v1302_v56 = vsub.f32 %v2582_v10, %v1301_v63 }
  0xef   :  { %1280 = vmatpush.msra.mxu3 %v1279_v59  ;;  %1203 = vmatpush.msra.mxu2 %v2562_v17  ;;  %v1307_v16 = vand.u32 4294901760, %v2593_v44  ;;  %v1303_v59 = vand.u32 4294901760, %v1302_v56 }
  0xf0   :  { %v634_v61 = vpop.f32.mrf.mxu0 }
  0xf1   :  { %v635_v18 = vadd.f32 %v634_v61, %v581_v30  ;;  %1286 = vmatpush.msra.mxu3 %v1285_v42  ;;  %v1297_v30 = vand.u32 4294901760, %v1296_v39  ;;  %1205 = vmatpush.msra.mxu2 %v2579_v41  ;;  %v1308_v25 = vsub.f32 %v2593_v44, %v1307_v16 }
  0xf3   :  { %1292 = vmatpush.msra.mxu3 %v1291_v57  ;;  %v1309_v9 = vand.u32 4294901760, %v1308_v25 }
  0xf5   :  { %1298 = vmatpush.msra.mxu3 %v1297_v30 }
  0xf7   :  { %v673_v19 = vpop.f32.mrf.mxu1  ;;  %1304 = vmatpush.msra.mxu3 %v1303_v59 }
  0xf8   :  { %v674_v7 = vadd.f32 %v673_v19, %v635_v18 }
  0xf9   :  { %1310 = vmatpush.msra.mxu3 %v1309_v9 }
  0xfa   :  { %v742_v22 = vpop.f32.mrf.mxu2 }
  0xfb   :  { %v743_v61 = vadd.f32 %v742_v22, %v674_v7 }
  0xfc   :  { %v779_v12 = vpop.f32.mrf.mxu3 }
  0xfd   :  { %v780_v55 = vadd.f32 %v779_v12, %v743_v61 }
  0xff   :  { %v1537_v18 = vmul.f32 -1.442695, %v780_v55 }
 0x101   :  { %1546 = vpow2.f32 %v1537_v18 }
 0x107   :  { %v1547_v42 = vpop.eup %1546 }
 0x108   :  { %v785_v50 = vadd.f32 1.0, %v1547_v42 }
 0x10a   :  { %1548 = vrcp.f32 %v785_v50  ;;  %v797_v39 = vand.u32 2147483648, %v785_v50  ;;  %v795_v34 = vand.u32 2147483647, %v785_v50  ;;  %vm791_vm1 = vweird.f32 %v785_v50 }
 0x10c   :  { %v798_v30 = vor.u32 1.1754944e-38, %v797_v39  ;;  %vm796_vm3 = vcmp.eq.f32.partialorder %v795_v34, 8.507059e+37 }
 0x110   :  { %v1549_v19 = vpop.eup %1548 }
 0x111   :  { %v787_v24 = vmul.f32 %v1549_v19, %v785_v50  ;;  %vm792_vm0 = vweird.f32 %v1549_v19 }
 0x112   :  { %vm793_vm2 = vmor %vm791_vm1, %vm792_vm0 }
 0x113   :  { %v788_v7 = vsub.f32 1.0, %v787_v24 }
 0x115   :  { %v789_v57 = vmul.f32 %v1549_v19, %v788_v7 }
 0x117   :  { %v790_v22 = vadd.f32 %v1549_v19, %v789_v57 }
 0x119   :  { %v794_v61 = vsel %vm793_vm2, %v1549_v19, %v790_v22 }
 0x11a   :  { %v799_v56 = vsel %vm796_vm3, %v798_v30, %v794_v61 }
 0x11b   :  { %v2605_v12 = vand.u32 4294901760, %v799_v56 }
 0x11d   :  { %971 = vmatmul.f32.vlgmr.msrb.gmra.mxu1 %v2605_v12  ;;  %v2609_v55 = vsub.f32 %v799_v56, %v2605_v12 }
 0x11e   :  { %1371 = vmatpush.msrb.mxu1 %v2394_v4 }
 0x11f   :  { %1025 = vmatmul.f32.vlgmr.msrb.gmra.mxu2 %v2609_v55  ;;  %v2614_v59 = vand.u32 4294901760, %v2609_v55 }
 0x120   :  { %1373 = vmatpush.msrb.mxu1 %v2405_v46  ;;  %1412 = vmatpush.msrb.mxu2 %v1217_v54 }
 0x121   :  { %1064 = vmatmul.f32.vlgmr.msrb.gmra.mxu3 %v2614_v59  ;;  %v868_v25 = vsub.f32 %v2609_v55, %v2614_v59 }
 0x122   :  { %1375 = vmatpush.msrb.mxu1 %v2411_v6  ;;  %1416 = vmatpush.msrb.mxu2 %v1223_v32 }
 0x123   :  { %1479 = vmatpush.msrb.mxu3 %v2394_v4  ;;  %v869_v18 = vand.u32 4294901760, %v868_v25  ;;  %v2770_v4 = vand.u32 4294901760, %v2453_v53 }
 0x124   :  { %1377 = vmatpush.msrb.mxu1 %v2423_v8  ;;  %1420 = vmatpush.msrb.mxu2 %v1229_v37 }
 0x125   :  { %1481 = vmatpush.msrb.mxu3 %v2405_v46  ;;  %870 = vmatmul.f32.vlgmr.msrb.gmra.mxu0 %v869_v18 }
 0x126   :  { %1170 = vmatmul.f32.vlgmr.msra.gmra.mxu1 %v2605_v12  ;;  %1318 = vmatpush.msrb.mxu0 %v2403_v20  ;;  %v2771_v20 = vand.u32 4294901760, %v2458_v60 }
 0x127   :  { %1379 = vmatpush.msrb.mxu1 %v2437_v5  ;;  %1424 = vmatpush.msrb.mxu2 %v1235_v62  ;;  %v1550_v62 = vld [vmem:[#allocation3] sm:$0xff] }
 0x128   :  { %1483 = vmatpush.msrb.mxu3 %v2411_v6  ;;  %1211 = vmatmul.f32.vlgmr.msra.gmra.mxu2 %v869_v18 }
 0x129   :  { %1321 = vmatpush.msrb.mxu0 %v2414_v38  ;;  %1381 = vmatpush.msrb.mxu1 %v2447_v11 }
 0x12a   :  { %1428 = vmatpush.msrb.mxu2 %v2770_v4  ;;  %1485 = vmatpush.msrb.mxu3 %v2423_v8 }
 0x12b   :  { %1312 = vmatmul.f32.vlgmr.msra.gmra.mxu3 %v2605_v12  ;;  %1324 = vmatpush.msrb.mxu0 %v2426_v28 }
 0x12c   :  { %1383 = vmatpush.msrb.mxu1 %v2455_v48  ;;  %1432 = vmatpush.msrb.mxu2 %v2771_v20 }
 0x12d   :  { %1487 = vmatpush.msrb.mxu3 %v2437_v5  ;;  %1327 = vmatpush.msrb.mxu0 %v2440_v51 }
 0x12e   :  { %1385 = vmatpush.msrb.mxu1 %v2469_v29  ;;  %1436 = vmatpush.msrb.mxu2 %v1253_v27 }
 0x12f   :  { %1489 = vmatpush.msrb.mxu3 %v2447_v11  ;;  %1133 = vmatmul.f32.vlgmr.msra.gmra.mxu0 %v2605_v12 }
 0x130   :  { %1330 = vmatpush.msrb.mxu0 %v2453_v53  ;;  %1387 = vmatpush.msrb.mxu1 %v2485_v1 }
 0x131   :  { %1440 = vmatpush.msrb.mxu2 %v1259_v0  ;;  %1491 = vmatpush.msrb.mxu3 %v2455_v48 }
 0x132   :  { %1333 = vmatpush.msrb.mxu0 %v2458_v60  ;;  %1389 = vmatpush.msrb.mxu1 %v2498_v45 }
 0x133   :  { %1444 = vmatpush.msrb.mxu2 %v1265_v58  ;;  %1493 = vmatpush.msrb.mxu3 %v2469_v29 }
 0x134   :  { %1336 = vmatpush.msrb.mxu0 %v2472_v40  ;;  %1391 = vmatpush.msrb.mxu1 %v2510_v47 }
 0x135   :  { %1448 = vmatpush.msrb.mxu2 %v1271_v15  ;;  %1495 = vmatpush.msrb.mxu3 %v2485_v1 }
 0x136   :  { %1339 = vmatpush.msrb.mxu0 %v2488_v33  ;;  %1393 = vmatpush.msrb.mxu1 %v2521_v43 }
 0x137   :  { %1452 = vmatpush.msrb.mxu2 %v1277_v35  ;;  %1497 = vmatpush.msrb.mxu3 %v2498_v45 }
 0x138   :  { %1342 = vmatpush.msrb.mxu0 %v2504_v13  ;;  %1395 = vmatpush.msrb.mxu1 %v2537_v31 }
 0x139   :  { %1456 = vmatpush.msrb.mxu2 %v1283_v3  ;;  %1499 = vmatpush.msrb.mxu3 %v2510_v47 }
 0x13a   :  { %1345 = vmatpush.msrb.mxu0 %v2513_v49  ;;  %1397 = vmatpush.msrb.mxu1 %v2550_v14  ;;  %v1551_v49 = vld [vmem:[#allocation3 + $0x8] sm:$0xff] }
 0x13b   :  { %1460 = vmatpush.msrb.mxu2 %v1289_v21  ;;  %1501 = vmatpush.msrb.mxu3 %v2521_v43 }
 0x13c   :  { %1348 = vmatpush.msrb.mxu0 %v2524_v36  ;;  %1399 = vmatpush.msrb.mxu1 %v2562_v17 }
 0x13d   :  { %1464 = vmatpush.msrb.mxu2 %v1295_v26  ;;  %1503 = vmatpush.msrb.mxu3 %v2537_v31 }
 0x13e   :  { %1351 = vmatpush.msrb.mxu0 %v2540_v23  ;;  %1401 = vmatpush.msrb.mxu1 %v2579_v41 }
 0x13f   :  { %1468 = vmatpush.msrb.mxu2 %v1301_v63  ;;  %1505 = vmatpush.msrb.mxu3 %v2550_v14 }
 0x140   :  { %1405 = vmatmul.f32.vlgmr.msrb.gmra.mxu1 %v2614_v59  ;;  %1354 = vmatpush.msrb.mxu0 %v2556_v52 }
 0x141   :  { %1472 = vmatpush.msrb.mxu2 %v1307_v16  ;;  %1507 = vmatpush.msrb.mxu3 %v2562_v17 }
 0x142   :  { %1474 = vmatmul.f32.vlgmr.msrb.gmra.mxu2 %v2605_v12  ;;  %1357 = vmatpush.msrb.mxu0 %v2565_v2 }
 0x143   :  { %1509 = vmatpush.msrb.mxu3 %v2579_v41 }
 0x144   :  { %1511 = vmatmul.f32.vlgmr.msrb.gmra.mxu3 %v2605_v12  ;;  %1360 = vmatpush.msrb.mxu0 %v2582_v10 }
 0x146   :  { %1363 = vmatpush.msrb.mxu0 %v2593_v44 }
 0x147   :  { %1366 = vmatmul.f32.vlgmr.msrb.gmra.mxu0 %v2609_v55 }
 0x19a   :  { %v972_v46 = vpop.f32.mrf.mxu1 }
 0x1a2   :  { %v871_v54 = vpop.f32.mrf.mxu0  ;;  %v1026_v38 = vpop.f32.mrf.mxu2 }
 0x1a3   :  { %v973_v6 = vadd.f32 %v972_v46, %v871_v54  ;;  %v1171_v51 = vpop.f32.mrf.mxu1 }
 0x1a4   :  { %v1065_v8 = vpop.f32.mrf.mxu3 }
 0x1a5   :  { %v1027_v32 = vadd.f32 %v1026_v38, %v973_v6 }
 0x1a7   :  { %v1066_v28 = vadd.f32 %v1065_v8, %v1027_v32 }
 0x1ab   :  { %v1212_v48 = vpop.f32.mrf.mxu2 }
 0x1ac   :  { %v1134_v37 = vpop.f32.mrf.mxu0 }
 0x1ad   :  { %v1135_v5 = vadd.f32 %v1134_v37, %v1066_v28 }
 0x1ae   :  { %v1313_v60 = vpop.f32.mrf.mxu3 }
 0x1af   :  { %v1172_v11 = vadd.f32 %v1171_v51, %v1135_v5  ;;  %v1314_v45 = vadd.f32 %v1313_v60, %v1212_v48 }
 0x1b1   :  { %v1515_v53 = vmul.f32 %v1550_v62, %v1172_v11 }
 0x1b3   :  { %1517 = vst [vmem:[#allocation9] sm:$0xff] %v1515_v53 }
 0x1bd   :  { %v1406_v40 = vpop.f32.mrf.mxu1 }
 0x1c4   :  { %v1367_v0 = vpop.f32.mrf.mxu0 }
 0x1c5   :  { %v1368_v29 = vadd.f32 %v1367_v0, %v1314_v45  ;;  %v1475_v1 = vpop.f32.mrf.mxu2 }
 0x1c7   :  { %v1407_v27 = vadd.f32 %v1406_v40, %v1368_v29  ;;  %v1512_v13 = vpop.f32.mrf.mxu3 }
 0x1c9   :  { %v1476_v33 = vadd.f32 %v1475_v1, %v1407_v27 }
 0x1cb   :  { %v1513_v47 = vadd.f32 %v1512_v13, %v1476_v33 }
 0x1cd   :  { %v1516_v58 = vmul.f32 %v1551_v49, %v1513_v47 }
 0x1cf   :  { %1518 = vst [vmem:[#allocation9 + $0x8] sm:$0xff] %v1516_v58 }
 0x1d0   :  { %1529 = dma.vmem_to_hbm [thread:$0]  %s1525_s7, 256, %s1527_s10, [#allocation5]  }
 0x1d1   :  { %1652 = dma.done.wait [#allocation5], 256  }
 0x1d2   :  { %1653 = vsyncadd [#allocation5], 4294967040 }
 0x1d3   :  { %1534 = vsyncpa [#allocation4], 1 }
 0x1d4   :  { %1535 = vsyncpa [#allocation7], 1 }
 0x1d5   :  { %1536 = vsyncpa [#allocation5], 1 }

</bundles_post_ra>
